<compile_context>
chip_gen: v7x
topology: tpu7x:2x2x1
jax: 0.10.0
libtpu: 0.0.40
codegen_flags: <defaults>
</compile_context>

<pallas_src>
import functools

import jax
import jax.numpy as jnp
from jax import lax
from jax.experimental import pallas as pl
from jax.experimental.pallas import tpu as pltpu


def _attention_kernel(q_ref, k_ref, v_ref, w_ref, b_ref, mask_ref, o_ref,
                      xcat_ref, *, d_model):
    # q_ref/k_ref/v_ref: (B*S, D) raw activations (rows are batch-major).
    # w_ref:   (3D, 3D) block-diagonal [Wq^T*s | Wk^T | Wv^T], (in, out) layout.
    # b_ref:   (1, 3D)  concatenated biases (bq already scaled by s).
    # mask_ref:(B*S, B*S) additive block-diagonal mask (0 inside batch, -1e30 outside).
    # o_ref:   (B*S, D)  attention output.
    # xcat_ref:(B*S, 3D) VMEM scratch holding the fused [q|k|v] activation slab.
    d = d_model

    # --- fused projection: one (BS, 3D) @ (3D, 3D) MXU matmul -------------
    xcat_ref[:, 0:d] = q_ref[...]
    xcat_ref[:, d:2 * d] = k_ref[...]
    xcat_ref[:, 2 * d:3 * d] = v_ref[...]
    proj = jnp.dot(xcat_ref[...], w_ref[...],
                   preferred_element_type=jnp.float32) + b_ref[...]
    q = proj[:, 0:d]            # already scaled by 1/sqrt(D) (folded into Wq, bq)
    k = proj[:, d:2 * d]
    v = proj[:, 2 * d:3 * d]

    # --- scores: contract feature dims directly (no K transpose) ----------
    scores = lax.dot_general(
        q, k,
        dimension_numbers=(((1,), (1,)), ((), ())),
        preferred_element_type=jnp.float32)          # (BS, BS)
    scores = scores + mask_ref[...]                  # block-diagonal additive mask

    # --- numerically stable softmax (masked cols -> exactly 0 weight) -----
    m = jnp.max(scores, axis=-1, keepdims=True)
    e = jnp.exp(scores - m)
    s = jnp.sum(e, axis=-1, keepdims=True)
    r = pl.reciprocal(s, approx=True)                # EUP vrcp: free bundle slot
    r = r * (2.0 - s * r)                            # one Newton step -> f32 accuracy
    w_attn = e * r

    out = jnp.dot(w_attn, v, preferred_element_type=jnp.float32)   # (BS, D)
    o_ref[...] = out.astype(o_ref.dtype)


def make_attention_params(wq, bq, wk, bk, wv, bv, batch, seq):
    """One-time (init) parameter packing. NOT in the per-call hot path.

    wq/wk/wv: PyTorch-style (out, in) = (D, D). bq/bk/bv: (D,).
    Returns (w_blockdiag (3D,3D), b_cat (1,3D), additive mask (B*S, B*S)).
    """
    d = wq.shape[0]
    scale = 1.0 / jnp.sqrt(jnp.float32(d))
    w = jnp.zeros((3 * d, 3 * d), jnp.float32)
    w = w.at[0:d, 0:d].set((wq * scale).T)           # fold softmax scale into Q proj
    w = w.at[d:2 * d, d:2 * d].set(wk.T)
    w = w.at[2 * d:3 * d, 2 * d:3 * d].set(wv.T)
    b = jnp.concatenate([bq * scale, bk, bv]).reshape(1, 3 * d).astype(jnp.float32)

    bs = batch * seq
    row_b = jnp.arange(bs, dtype=jnp.int32) // seq
    mask = jnp.where(row_b[:, None] == row_b[None, :], 0.0, -1e30).astype(jnp.float32)
    return w, b, mask


@jax.jit
def attention(query, key, value, w, b, mask):
    """query/key/value: (B, S, D). w/b/mask: precomputed by make_attention_params."""
    B, S, D = query.shape
    BS = B * S
    vmem = pl.BlockSpec(memory_space=pltpu.MemorySpace.VMEM)
    out = pl.pallas_call(
        functools.partial(_attention_kernel, d_model=D),
        out_shape=jax.ShapeDtypeStruct((BS, D), query.dtype),
        in_specs=[vmem, vmem, vmem, vmem, vmem, vmem],
        out_specs=vmem,
        scratch_shapes=[pltpu.VMEM((BS, 3 * D), jnp.float32)],
    )(query.reshape(BS, D), key.reshape(BS, D), value.reshape(BS, D), w, b, mask)
    return out.reshape(B, S, D)


def attention_ref(query, key, value, wq, bq, wk, bk, wv, bv):
    Q = query @ wq.T + bq
    K = key @ wk.T + bk
    V = value @ wv.T + bv
    scores = jnp.einsum("bqd,bkd->bqk", Q, K) / jnp.sqrt(jnp.float32(Q.shape[-1]))
    w = jax.nn.softmax(scores, axis=-1)
    return jnp.einsum("bqk,bkd->bqd", w, V)


if __name__ == "__main__":
    B, S, D = 2, 8, 32
    key0 = jax.random.PRNGKey(0)
    ks = jax.random.split(key0, 9)

    # Deterministic synthetic parameters (nn.Linear(D, D) style: weight (D, D), bias (D,)).
    lim = 1.0 / jnp.sqrt(jnp.float32(D))
    wq = jax.random.uniform(ks[0], (D, D), jnp.float32, -lim, lim)
    bq = jax.random.uniform(ks[1], (D,), jnp.float32, -lim, lim)
    wk = jax.random.uniform(ks[2], (D, D), jnp.float32, -lim, lim)
    bk = jax.random.uniform(ks[3], (D,), jnp.float32, -lim, lim)
    wv = jax.random.uniform(ks[4], (D, D), jnp.float32, -lim, lim)
    bv = jax.random.uniform(ks[5], (D,), jnp.float32, -lim, lim)

    query = jax.random.normal(ks[6], (B, S, D), jnp.float32)
    key_in = jax.random.normal(ks[7], (B, S, D), jnp.float32)
    value = jax.random.normal(ks[8], (B, S, D), jnp.float32)

    # One-time parameter packing (constant across calls -> outside the hot path).
    w_pack, b_pack, mask = make_attention_params(wq, bq, wk, bk, wv, bv, B, S)
    w_pack, b_pack, mask = jax.block_until_ready((w_pack, b_pack, mask))

    out = attention(query, key_in, value, w_pack, b_pack, mask)
    out = jax.block_until_ready(out)

    ref = attention_ref(query, key_in, value, wq, bq, wk, bk, wv, bv)
    assert out.shape == (B, S, D)
    assert jnp.allclose(out, ref, atol=1e-4, rtol=1e-4), "mismatch vs reference"

    print("KERNEL_OK")
</pallas_src>

<mosaic_0001>
module attributes {stable_mosaic.version = 11 : i64} {
  func.func @_attention_kernel(%arg0: memref<16x32xf32, #tpu.memory_space<vmem>>, %arg1: memref<16x32xf32, #tpu.memory_space<vmem>>, %arg2: memref<16x32xf32, #tpu.memory_space<vmem>>, %arg3: memref<96x96xf32, #tpu.memory_space<vmem>>, %arg4: memref<1x96xf32, #tpu.memory_space<vmem>>, %arg5: memref<16x16xf32, #tpu.memory_space<vmem>>, %arg6: memref<16x32xf32, #tpu.memory_space<vmem>>, %arg7: memref<16x96xf32, #tpu.memory_space<vmem>>) attributes {dimension_semantics = [], scalar_prefetch = 0 : i64, scratch_operands = 1 : i64, tpu.core_type = #tpu.core_type<tc>} {
    %c0 = arith.constant 0 : index
    %c0_0 = arith.constant 0 : index
    %0 = vector.load %arg0[%c0, %c0_0] : memref<16x32xf32, #tpu.memory_space<vmem>>, vector<16x32xf32>
    %c0_1 = arith.constant 0 : index
    %c0_2 = arith.constant 0 : index
    %1 = vector.load %arg7[%c0_1, %c0_2] : memref<16x96xf32, #tpu.memory_space<vmem>>, vector<16x32xf32>
    tpu.vector_store %arg7[%c0_1, %c0_2], %0 {strides = array<i32>} : memref<16x96xf32, #tpu.memory_space<vmem>>, vector<16x32xf32>,
    %c0_3 = arith.constant 0 : index
    %c0_4 = arith.constant 0 : index
    %2 = vector.load %arg1[%c0_3, %c0_4] : memref<16x32xf32, #tpu.memory_space<vmem>>, vector<16x32xf32>
    %c0_5 = arith.constant 0 : index
    %c32 = arith.constant 32 : index
    %3 = vector.load %arg7[%c0_5, %c32] : memref<16x96xf32, #tpu.memory_space<vmem>>, vector<16x32xf32>
    tpu.vector_store %arg7[%c0_5, %c32], %2 {strides = array<i32>} : memref<16x96xf32, #tpu.memory_space<vmem>>, vector<16x32xf32>,
    %c0_6 = arith.constant 0 : index
    %c0_7 = arith.constant 0 : index
    %4 = vector.load %arg2[%c0_6, %c0_7] : memref<16x32xf32, #tpu.memory_space<vmem>>, vector<16x32xf32>
    %c0_8 = arith.constant 0 : index
    %c64 = arith.constant 64 : index
    %5 = vector.load %arg7[%c0_8, %c64] : memref<16x96xf32, #tpu.memory_space<vmem>>, vector<16x32xf32>
    tpu.vector_store %arg7[%c0_8, %c64], %4 {strides = array<i32>} : memref<16x96xf32, #tpu.memory_space<vmem>>, vector<16x32xf32>,
    %c0_9 = arith.constant 0 : index
    %c0_10 = arith.constant 0 : index
    %6 = vector.load %arg7[%c0_9, %c0_10] : memref<16x96xf32, #tpu.memory_space<vmem>>, vector<16x96xf32>
    %c0_11 = arith.constant 0 : index
    %c0_12 = arith.constant 0 : index
    %7 = vector.load %arg3[%c0_11, %c0_12] : memref<96x96xf32, #tpu.memory_space<vmem>>, vector<96x96xf32>
    %cst = arith.constant dense<0.000000e+00> : vector<16x96xf32>
    %8 = tpu.matmul %6, %7, %cst {dimension_numbers = #tpu.dot_dimension_numbers<[1], [0], [0], [1], [0, 0, 1, 1], [], []>} : vector<16x96xf32>, vector<96x96xf32>, vector<16x96xf32> -> vector<16x96xf32>
    %c0_13 = arith.constant 0 : index
    %c0_14 = arith.constant 0 : index
    %9 = vector.load %arg4[%c0_13, %c0_14] : memref<1x96xf32, #tpu.memory_space<vmem>>, vector<1x96xf32>
    %10 = vector.broadcast %9 : vector<1x96xf32> to vector<16x96xf32>
    %11 = arith.addf %8, %10 : vector<16x96xf32>
    %12 = vector.extract_strided_slice %11 {offsets = [0, 0], sizes = [16, 32], strides = [1, 1]} : vector<16x96xf32> to vector<16x32xf32>
    %13 = vector.extract_strided_slice %11 {offsets = [0, 32], sizes = [16, 32], strides = [1, 1]} : vector<16x96xf32> to vector<16x32xf32>
    %14 = vector.extract_strided_slice %11 {offsets = [0, 64], sizes = [16, 32], strides = [1, 1]} : vector<16x96xf32> to vector<16x32xf32>
    %cst_15 = arith.constant dense<0.000000e+00> : vector<16x16xf32>
    %15 = tpu.matmul %12, %13, %cst_15 {dimension_numbers = #tpu.dot_dimension_numbers<[1], [1], [0], [0], [0, 0, 1, 0], [], []>} : vector<16x32xf32>, vector<16x32xf32>, vector<16x16xf32> -> vector<16x16xf32>
    %c0_16 = arith.constant 0 : index
    %c0_17 = arith.constant 0 : index
    %16 = vector.load %arg5[%c0_16, %c0_17] : memref<16x16xf32, #tpu.memory_space<vmem>>, vector<16x16xf32>
    %17 = arith.addf %15, %16 : vector<16x16xf32>
    %cst_18 = arith.constant dense<0xFF800000> : vector<16xf32>
    %18 = vector.multi_reduction <maximumf>, %17, %cst_18 [1] : vector<16x16xf32> to vector<16xf32>
    %19 = vector.shape_cast %18 : vector<16xf32> to vector<16x1xf32>
    %20 = vector.broadcast %19 : vector<16x1xf32> to vector<16x16xf32>
    %21 = arith.subf %17, %20 : vector<16x16xf32>
    %22 = math.exp %21 : vector<16x16xf32>
    %cst_19 = arith.constant dense<0.000000e+00> : vector<16xf32>
    %23 = vector.multi_reduction <add>, %22, %cst_19 [1] : vector<16x16xf32> to vector<16xf32>
    %24 = vector.shape_cast %23 : vector<16xf32> to vector<16x1xf32>
    %25 = tpu.reciprocal %24 {approx = true} : vector<16x1xf32> -> vector<16x1xf32>
    %26 = arith.mulf %24, %25 : vector<16x1xf32>
    %cst_20 = arith.constant 2.000000e+00 : f32
    %27 = vector.broadcast %cst_20 : f32 to vector<16x1xf32>
    %28 = arith.subf %27, %26 : vector<16x1xf32>
    %29 = arith.mulf %25, %28 : vector<16x1xf32>
    %30 = vector.broadcast %29 : vector<16x1xf32> to vector<16x16xf32>
    %31 = arith.mulf %22, %30 : vector<16x16xf32>
    %cst_21 = arith.constant dense<0.000000e+00> : vector<16x32xf32>
    %32 = tpu.matmul %31, %14, %cst_21 {dimension_numbers = #tpu.dot_dimension_numbers<[1], [0], [0], [1], [0, 0, 1, 1], [], []>} : vector<16x16xf32>, vector<16x32xf32>, vector<16x32xf32> -> vector<16x32xf32>
    %c0_22 = arith.constant 0 : index
    %c0_23 = arith.constant 0 : index
    %33 = vector.load %arg6[%c0_22, %c0_23] : memref<16x32xf32, #tpu.memory_space<vmem>>, vector<16x32xf32>
    tpu.vector_store %arg6[%c0_22, %c0_23], %32 {strides = array<i32>} : memref<16x32xf32, #tpu.memory_space<vmem>>, vector<16x32xf32>,
    return
  }
}

</mosaic_0001>

<bundles_post_ra>
// kernel: attention.1
= control target key start
LH: loop header
LB: loop body
LE: loop exit
PB: predicated region body
PF: predicated region fallthrough
CT: control target
= control target key end

     0   :  { %11 = vsyncpa [#allocation4], 0  ;;  %s853_s0 = inlined_call_operand.hbm [shape: f32[16,32], index: 0, kind: input, shape index: {}]   ;;  %s854_s1 = inlined_call_operand.hbm [shape: f32[16,32], index: 1, kind: input, shape index: {}]   ;;  %s855_s2 = inlined_call_operand.vmem [shape: f32[16,32], index: 2, kind: input, shape index: {}]   ;;  %s856_s3 = inlined_call_operand.hbm [shape: f32[96,96], index: 3, kind: input, shape index: {}]   ;;  %s857_s4 = inlined_call_operand.vmem [shape: f32[1,96], index: 4, kind: input, shape index: {}]   ;;  %s858_s5 = inlined_call_operand.hbm [shape: f32[16,16], index: 5, kind: input, shape index: {}]   ;;  %s859_s6 = inlined_call_operand.hbm [shape: f32[16,32], index: 6, kind: output, shape index: {}]  }
   0x1   :  { %12 = vsyncpa [#allocation7], 0 }
   0x2   :  { %13 = vsyncpa [#allocation10], 0 }
   0x3   :  { %14 = vsyncpa [#allocation5], 0  ;;  %s693_s21 = smov [#allocation6]   ;;  %s694_s23 = smov [#allocation3]  }
   0x4   :  { %s32_s22 = sshll.u32 %s693_s21, 4  ;;  %s20_s24 = sshll.u32 %s694_s23, 4  ;;  %s33_s22 = int_to_ptr.vmem [resolvable:$true] %s32_s22  ;;  %s738_s24 = int_to_ptr.vmem [resolvable:$true] %s20_s24 }
   0x5   :  { %s575_s27 = scalar_lea.hbm %s854_s1, 256 }
   0x6   :  { %p576_p0 = scmp.ne.s32.totalorder %s854_s1, %s575_s27  ;;  %p579_p1 = scmp.lt.u32.totalorder %s575_s27, %s854_s1 }
   0x8   :  { %p581_p2 = pnand %p579_p1, %p576_p0 }
   0xa   :  { %584 = shalt.err (!%p581_p2)
}
   0xb   :  { %s585_s8 = scalar_lea.vmem %s33_s22, 256  ;;  %p590_p4 = scmp.lt.s32.totalorder %s33_s22, %s33_s22 }
   0xc   :  { %p586_p3 = scmp.ne.s32.totalorder %s33_s22, %s585_s8  ;;  %p591_p5 = scmp.lt.s32.totalorder %s585_s8, %s585_s8 }
   0xe   :  { %p592_p6 = por %p591_p5, %p590_p4 }
  0x10   :  { %p593_p7 = pnand %p592_p6, %p586_p3 }
  0x12   :  { %596 = shalt.err (!%p593_p7)
}
  0x13   :  { %s695_s9 = smov 128   ;;  %s696_s10 = smov 8  }
  0x14   :  { %38 = dma.hbm_to_vmem [thread:$0]  %s854_s1, 256, %s33_s22, [#allocation7], %s695_s9, %s695_s9, %s696_s10  }
  0x15   :  { %s597_s15 = scalar_lea.hbm %s853_s0, 256 }
  0x16   :  { %p598_p8 = scmp.ne.s32.totalorder %s853_s0, %s597_s15  ;;  %p601_p9 = scmp.lt.u32.totalorder %s597_s15, %s853_s0 }
  0x18   :  { %p603_p10 = pnand %p601_p9, %p598_p8 }
  0x1a   :  { %606 = shalt.err (!%p603_p10)
}
  0x1b   :  { %s607_s20 = scalar_lea.vmem %s738_s24, 256  ;;  %p612_p12 = scmp.lt.s32.totalorder %s738_s24, %s738_s24 }
  0x1c   :  { %p608_p11 = scmp.ne.s32.totalorder %s738_s24, %s607_s20  ;;  %p613_p13 = scmp.lt.s32.totalorder %s607_s20, %s607_s20 }
  0x1e   :  { %p614_p0 = por %p613_p13, %p612_p12 }
  0x20   :  { %p615_p1 = pnand %p614_p0, %p608_p11 }
  0x22   :  { %618 = shalt.err (!%p615_p1)
}
  0x23   :  { %26 = dma.hbm_to_vmem [thread:$0]  %s853_s0, 256, %s738_s24, [#allocation4], %s695_s9, %s695_s9, %s696_s10  }
  0x24   :  { %s697_s22 = smov [#allocation8]   ;;  %s698_s25 = smov [#allocation9]  }
  0x25   :  { %s46_s23 = sshll.u32 %s697_s22, 4  ;;  %s60_s26 = sshll.u32 %s698_s25, 4  ;;  %s47_s23 = int_to_ptr.vmem [resolvable:$true] %s46_s23  ;;  %s775_s26 = int_to_ptr.vmem [resolvable:$true] %s60_s26 }
  0x26   :  { %s619_s29 = scalar_lea.hbm %s856_s3, 1536 }
  0x27   :  { %p620_p2 = scmp.ne.s32.totalorder %s856_s3, %s619_s29  ;;  %p623_p3 = scmp.lt.u32.totalorder %s619_s29, %s856_s3 }
  0x29   :  { %p625_p4 = pnand %p623_p3, %p620_p2 }
  0x2b   :  { %628 = shalt.err (!%p625_p4)
}
  0x2c   :  { %s629_s0 = scalar_lea.vmem %s47_s23, 1536  ;;  %p634_p6 = scmp.lt.s32.totalorder %s47_s23, %s47_s23 }
  0x2d   :  { %p630_p5 = scmp.ne.s32.totalorder %s47_s23, %s629_s0  ;;  %p635_p7 = scmp.lt.s32.totalorder %s629_s0, %s629_s0 }
  0x2f   :  { %p636_p8 = por %p635_p7, %p634_p6 }
  0x31   :  { %p637_p9 = pnand %p636_p8, %p630_p5 }
  0x33   :  { %640 = shalt.err (!%p637_p9)
}
  0x34   :  { %52 = dma.hbm_to_vmem [thread:$0]  %s856_s3, 1536, %s47_s23, [#allocation7], %s695_s9, %s695_s9, %s696_s10  }
  0x35   :  { %s641_s15 = scalar_lea.hbm %s858_s5, 256 }
  0x36   :  { %p642_p10 = scmp.ne.s32.totalorder %s858_s5, %s641_s15  ;;  %p645_p11 = scmp.lt.u32.totalorder %s641_s15, %s858_s5 }
  0x38   :  { %p647_p12 = pnand %p645_p11, %p642_p10 }
  0x3a   :  { %650 = shalt.err (!%p647_p12)
}
  0x3b   :  { %s651_s20 = scalar_lea.vmem %s775_s26, 256  ;;  %p656_p0 = scmp.lt.s32.totalorder %s775_s26, %s775_s26 }
  0x3c   :  { %p652_p13 = scmp.ne.s32.totalorder %s775_s26, %s651_s20  ;;  %p657_p1 = scmp.lt.s32.totalorder %s651_s20, %s651_s20 }
  0x3e   :  { %p658_p2 = por %p657_p1, %p656_p0 }
  0x40   :  { %p659_p3 = pnand %p658_p2, %p652_p13 }
  0x42   :  { %662 = shalt.err (!%p659_p3)
}
  0x43   :  { %66 = dma.hbm_to_vmem [thread:$0]  %s858_s5, 256, %s775_s26, [#allocation10], %s695_s9, %s695_s9, %s696_s10  }
  0x44   :  { %685 = dma.done.wait [#allocation4], 256  }
  0x45   :  { %686 = vsyncadd [#allocation4], 4294967040 }
  0x46   :  { %687 = dma.done.wait [#allocation7], 1792  }
  0x47   :  { %688 = vsyncadd [#allocation7], 4294965504 }
  0x48   :  { %689 = dma.done.wait [#allocation10], 256  }
  0x49   :  { %690 = vsyncadd [#allocation10], 4294967040  ;;  %v84_v0 = vld [vmem:[#allocation6] sm:$0xff]  ;;  %s699_s23 = smov 32   ;;  %s700_s25 = smov 64   ;;  %v85_v2 = vld [vmem:[#allocation6 + $0x8] sm:$0xff] }
  0x4a   :  { %v97_v1 = vld [vmem:[%s855_s2] sm:$0xff]  ;;  %88 = vrot.lane.b32.xlu0 %v84_v0, %s699_s23  ;;  %v112_v3 = vld [vmem:[#allocation8] sm:$0xff]  ;;  %v113_v4 = vld [vmem:[#allocation8 + $0x8] sm:$0xff]  ;;  %vm81_vm0 = vcmask 261120   ;;  %vm94_vm1 = vcmask 523520   ;;  %vm107_vm2 = vcmask 785920  }
  0x4b   :  { %101 = vrot.lane.b32.xlu1 %v97_v1, %s700_s25  ;;  %v98_v5 = vld [vmem:[%s855_s2 + $0x8] sm:$0xff]  ;;  %v513_v6 = vpack.c.bf16 %v113_v4, %v112_v3  ;;  %v114_v7 = vld [vmem:[#allocation8 + $0x10] sm:$0xff]  ;;  %v79_v10 = vld [vmem:[#allocation3] sm:$0xff]  ;;  %vm131_vm3 = vcmask 785408   ;;  %s701_s28 = smov 96   ;;  %vm304_vm5 = vcmask 130048  }
  0x4c   :  { %v115_v8 = vld [vmem:[#allocation8 + $0x18] sm:$0xff]  ;;  %v116_v11 = vld [vmem:[#allocation8 + $0x20] sm:$0xff]  ;;  %v117_v12 = vld [vmem:[#allocation8 + $0x28] sm:$0xff]  ;;  %82 = vst.msk [vmem:[#allocation2] sm:$0xff] %vm81_vm0, %v79_v10 }
  0x4d   :  { %v517_v9 = vpack.c.bf16 %v115_v8, %v114_v7  ;;  %514 = vmatprep.subr.bf16.mxu0 %v513_v6  ;;  %v80_v13 = vld [vmem:[#allocation3 + $0x8] sm:$0xff]  ;;  %v521_v14 = vpack.c.bf16 %v117_v12, %v116_v11  ;;  %v118_v15 = vld [vmem:[#allocation8 + $0x30] sm:$0xff]  ;;  %v119_v16 = vld [vmem:[#allocation8 + $0x38] sm:$0xff] }
  0x4e   :  { %90 = vrot.lane.b32.xlu0 %v85_v2, %s699_s23  ;;  %83 = vst.msk [vmem:[#allocation2 + $0x8] sm:$0xff] %vm81_vm0, %v80_v13  ;;  %516 = vmatpush3.bf16.msra.mxu0 %v513_v6  ;;  %v525_v17 = vpack.c.bf16 %v119_v16, %v118_v15  ;;  %v120_v18 = vld [vmem:[#allocation8 + $0x40] sm:$0xff]  ;;  %v121_v19 = vld [vmem:[#allocation8 + $0x48] sm:$0xff]  ;;  %v122_v21 = vld [vmem:[#allocation8 + $0x50] sm:$0xff] }
  0x4f   :  { %103 = vrot.lane.b32.xlu1 %v98_v5, %s700_s25  ;;  %518 = vmatprep.subr.bf16.mxu0 %v517_v9  ;;  %v529_v20 = vpack.c.bf16 %v121_v19, %v120_v18  ;;  %v123_v22 = vld [vmem:[#allocation8 + $0x58] sm:$0xff]  ;;  %v441_v30 = vld [vmem:[%s857_s4] ss:$0 sm:$0xff]  ;;  %vm538_vm4 = vmpackc.low %vm81_vm0, %vm81_vm0  ;;  %s702_s4 = smov [#allocation11]  }
  0x50   :  { %v533_v23 = vpack.c.bf16 %v123_v22, %v122_v21  ;;  %v214_v40 = vld [vmem:[#allocation9 + $0x8] sm:$0xff]  ;;  %v213_v41 = vld [vmem:[#allocation9] sm:$0xff]  ;;  %s427_s29 = sshll.u32 %s702_s4, 4  ;;  %s428_s29 = int_to_ptr.vmem [resolvable:$true] %s427_s29 }
  0x51   :  { %s663_s30 = scalar_lea.vmem %s428_s29, 256  ;;  %p668_p5 = scmp.lt.s32.totalorder %s428_s29, %s428_s29 }
  0x52   :  { %520 = vmatpush3.bf16.msra.mxu0 %v517_v9  ;;  %p664_p4 = scmp.ne.s32.totalorder %s428_s29, %s663_s30  ;;  %p669_p6 = scmp.lt.s32.totalorder %s663_s30, %s663_s30 }
  0x53   :  { %522 = vmatprep.subr.bf16.mxu0 %v521_v14 }
  0x54   :  { %p670_p7 = por %p669_p6, %p668_p5 }
  0x56   :  { %524 = vmatpush3.bf16.msra.mxu0 %v521_v14  ;;  %p671_p8 = pnand %p670_p7, %p664_p4 }
  0x57   :  { %526 = vmatprep.subr.bf16.mxu0 %v525_v17 }
  0x5a   :  { %528 = vmatpush3.bf16.msra.mxu0 %v525_v17 }
  0x5b   :  { %530 = vmatprep.subr.bf16.mxu0 %v529_v20 }
  0x5e   :  { %532 = vmatpush3.bf16.msra.mxu0 %v529_v20 }
  0x5f   :  { %534 = vmatprep.subr.bf16.mxu0 %v533_v23 }
  0x62   :  { %536 = vmatpush3.bf16.msra.mxu0 %v533_v23 }
  0xbc   :  { %v89_v24 = vpop.permute.xlu0 %88 }
  0xbd   :  { %v102_v25 = vpop.permute.xlu1 %101  ;;  %95 = vst.msk [vmem:[#allocation2] sm:$0xff] %vm94_vm1, %v89_v24 }
  0xbe   :  { %108 = vst.msk [vmem:[#allocation2] sm:$0xff] %vm107_vm2, %v102_v25 }
  0xc0   :  { %v91_v26 = vpop.permute.xlu0 %90 }
  0xc1   :  { %v104_v27 = vpop.permute.xlu1 %103  ;;  %96 = vst.msk [vmem:[#allocation2 + $0x8] sm:$0xff] %vm94_vm1, %v91_v26 }
  0xc2   :  { %109 = vst.msk [vmem:[#allocation2 + $0x8] sm:$0xff] %vm107_vm2, %v104_v27 }
  0xc5   :  { %v110_v28 = vld [vmem:[#allocation2] sm:$0xff] }
  0xc6   :  { %496 = vmatprep.mubr.msk.f32.mxu0 %vm131_vm3, %v110_v28 }
  0xc9   :  { %v111_v29 = vld [vmem:[#allocation2 + $0x8] sm:$0xff] }
  0xca   :  { %497 = vmatmul.mubr.msk.f32.vlgmr.msra.gmra.mrb[0].mxu0 %vm131_vm3, %v111_v29 }
 0x19d   :  { %v498_v31 = vpop.f32.mrb[0].mxu0 }
 0x19e   :  { %v210_v32 = vadd.f32 %v498_v31, %v441_v30  ;;  %v204_v33 = vpop.f32.mrb[1].mxu0 }
 0x19f   :  { %v205_v34 = vadd.f32 %v441_v30, %v204_v33 }
 0x1a1   :  { %503 = vmatprep.mubr.msk.f32.mxu1 %vm81_vm0, %v205_v34  ;;  %v557_v35 = vpack.i.bf16 %v210_v32, %v205_v34 }
 0x1a3   :  { %558 = vrot.lane.b32.xlu0 %v557_v35, %s701_s28 }
 0x215   :  { %v559_v36 = vpop.permute.xlu0 %558 }
 0x216   :  { %v561_v37 = vunpack.i.h.bf16 %v559_v36  ;;  %v560_v38 = vunpack.i.l.bf16 %v559_v36 }
 0x218   :  { %v537_v39 = vpack.c.bf16 %v561_v37, %v560_v38 }
 0x21a   :  { %539 = vmatprep.subr.msk.bf16.mxu1 %vm538_vm4, %v537_v39 }
 0x21b   :  { %542 = vmatpush3.bf16.xpose.msk.msra.mxu1 %vm538_vm4, %v537_v39 }
 0x222   :  { %504 = vmatmul.mubr.msk.f32.vlgmr.msra.gmra.mrb[0].mxu1 %vm81_vm0, %v210_v32 }
 0x2f5   :  { %v505_v42 = vpop.f32.mrb[0].mxu1 }
 0x2f6   :  { %v301_v43 = vadd.f32 %v505_v42, %v214_v40  ;;  %v295_v44 = vpop.f32.mrb[1].mxu1 }
 0x2f7   :  { %v296_v45 = vadd.f32 %v295_v44, %v213_v41 }
 0x2f8   :  { %v308_v46 = vsel %vm304_vm5, %v301_v43, -inf }
 0x2f9   :  { %309 = vmax.xlane.f32.xlu0 %v308_v46  ;;  %v305_v47 = vsel %vm304_vm5, %v296_v45, -inf }
 0x2fa   :  { %306 = vmax.xlane.f32.xlu1 %v305_v47 }
 0x386   :  { %v310_v48 = vpop.xlane.xlu0 %309 }
 0x387   :  { %v312_v49 = vsub.f32 %v301_v43, %v310_v48  ;;  %v307_v50 = vpop.xlane.xlu1 %306 }
 0x388   :  { %v311_v51 = vsub.f32 %v296_v45, %v307_v50 }
 0x389   :  { %v315_v52 = vmul.f32 1.442695, %v312_v49 }
 0x38a   :  { %v313_v53 = vmul.f32 1.442695, %v311_v51 }
 0x38b   :  { %567 = vpow2.f32 %v315_v52 }
 0x38c   :  { %569 = vpow2.f32 %v313_v53 }
 0x395   :  { %v568_v54 = vpop.eup %567 }
 0x396   :  { %v570_v55 = vpop.eup %569  ;;  %v320_v56 = vsel %vm304_vm5, %v568_v54, 0.0 }
 0x397   :  { %321 = vadd.xlane.f32.xlu1 %v320_v56  ;;  %v317_v57 = vsel %vm304_vm5, %v570_v55, 0.0 }
 0x398   :  { %318 = vadd.xlane.f32.xlu0 %v317_v57 }
 0x3ae   :  { %563 = vrot.lane.b32.xlu0 %v557_v35, %s700_s25 }
 0x424   :  { %v322_v58 = vpop.xlane.xlu1 %321 }
 0x425   :  { %571 = vrcp.f32 %v322_v58  ;;  %v319_v59 = vpop.xlane.xlu0 %318 }
 0x426   :  { %573 = vrcp.f32 %v319_v59 }
 0x429   :  { %v564_v60 = vpop.permute.xlu0 %563 }
 0x42a   :  { %v566_v61 = vunpack.i.h.bf16 %v564_v60  ;;  %v565_v62 = vunpack.i.l.bf16 %v564_v60 }
 0x42c   :  { %v543_v63 = vpack.c.bf16 %v566_v61, %v565_v62 }
 0x42e   :  { %544 = vmatprep.subr.bf16.mxu1 %v543_v63 }
 0x42f   :  { %v572_v0 = vpop.eup %571  ;;  %546 = vmatpush3.bf16.msra.mxu1 %v543_v63 }
 0x430   :  { %v574_v1 = vpop.eup %573  ;;  %v326_v2 = vmul.f32 %v572_v0, %v322_v58 }
 0x431   :  { %v325_v3 = vmul.f32 %v574_v1, %v319_v59 }
 0x432   :  { %v328_v4 = vsub.f32 2.0, %v326_v2 }
 0x433   :  { %v327_v5 = vsub.f32 2.0, %v325_v3 }
 0x434   :  { %v330_v6 = vmul.f32 %v572_v0, %v328_v4 }
 0x435   :  { %v329_v7 = vmul.f32 %v574_v1, %v327_v5 }
 0x436   :  { %v332_v9 = vmul.f32 %v568_v54, %v330_v6 }
 0x437   :  { %v331_v8 = vmul.f32 %v570_v55, %v329_v7 }
 0x439   :  { %510 = vmatprep.mubr.msk.f32.mxu1 %vm304_vm5, %v331_v8 }
 0x43a   :  { %511 = vmatmul.mubr.msk.f32.vlgmr.msra.gmra.mrb[2].mxu1 %vm304_vm5, %v332_v9 }
 0x50d   :  { %v512_v10 = vpop.f32.mrb[2].mxu1 }
 0x50e   :  { %421 = vst.msk [vmem:[#allocation11 + $0x8] sm:$0xff] %vm81_vm0, %v512_v10  ;;  %v411_v11 = vpop.f32.mrb[3].mxu1 }
 0x50f   :  { %420 = vst.msk [vmem:[#allocation11] sm:$0xff] %vm81_vm0, %v411_v11 }
 0x510   :  { %674 = shalt.err (!%p671_p8)
}
 0x511   :  { %s675_s11 = scalar_lea.hbm %s859_s6, 256 }
 0x512   :  { %p676_p9 = scmp.ne.s32.totalorder %s859_s6, %s675_s11  ;;  %p679_p10 = scmp.lt.u32.totalorder %s675_s11, %s859_s6 }
 0x514   :  { %p681_p11 = pnand %p679_p10, %p676_p9 }
 0x516   :  { %684 = shalt.err (!%p681_p11)
}
 0x517   :  { %433 = dma.vmem_to_hbm [thread:$0]  %s428_s29, 256, %s859_s6, [#allocation5], %s695_s9, %s695_s9, %s696_s10  }
 0x518   :  { %691 = dma.done.wait [#allocation5], 256  }
 0x519   :  { %692 = vsyncadd [#allocation5], 4294967040 }
 0x51a   :  { %437 = vsyncpa [#allocation4], 1 }
 0x51b   :  { %438 = vsyncpa [#allocation7], 1 }
 0x51c   :  { %439 = vsyncpa [#allocation10], 1 }
 0x51d   :  { %440 = vsyncpa [#allocation5], 1 }

</bundles_post_ra>
